<compile_context>
chip_gen: v6e
topology: v6e:2x2x1
jax: 0.10.0
libtpu: 0.0.40
codegen_flags: <defaults>
</compile_context>

<pallas_src>
import functools
import math

import jax
import jax.numpy as jnp
from jax.experimental import pallas as pl
from jax.experimental.pallas import tpu as pltpu


def _gcn_critic_kernel(n_conv, n_mlp, x_ref, adj_ref, pool_ref, *refs):
    """Fused GCN_Critic forward.

    refs = [cw1, cb1, ..., cwN, cbN, mw1, mb1, ..., mwM, mbM, out_w, out_b, out_ref]
    """
    out_ref = refs[-1]
    p = refs[:-1]

    x = x_ref[...]        # (BN, IN_PAD) node features (lane-padded)
    adj = adj_ref[...]    # (BN, BN) gcn-normalized dense adjacency (with self loops)

    idx = 0
    for _ in range(n_conv):
        w = p[idx][...]
        b = p[idx + 1][...]
        idx += 2
        xw = jnp.dot(x, w, preferred_element_type=jnp.float32)            # lin(x)
        x = jnp.maximum(
            jnp.dot(adj, xw, preferred_element_type=jnp.float32) + b, 0.0)
        # TODO(synk): F.dropout(p=0.4, training=self.training) omitted — identity in eval mode.

    # global_add_pool: per-graph sum as a dense one-hot pooling matmul (MXU-friendly,
    # avoids sublane reshapes / segment reductions inside the kernel).
    x = jnp.dot(pool_ref[...], x, preferred_element_type=jnp.float32)     # (B, embed)

    for _ in range(n_mlp):
        w = p[idx][...]
        b = p[idx + 1][...]
        idx += 2
        x = jnp.maximum(
            jnp.dot(x, w, preferred_element_type=jnp.float32) + b, 0.0)
        # TODO(synk): dropout omitted — identity in eval mode.

    wo = p[-2][...]       # (hidden, OUT_PAD) zero-padded to lane-dense width
    bo = p[-1][...]
    x = jnp.dot(x, wo, preferred_element_type=jnp.float32) + bo
    out_ref[...] = jax.nn.sigmoid(x)


def _preprocess(actions, node_features, edge_index, in_pad):
    """Feature assembly + dense normalized adjacency + pooling matrix (plain XLA)."""
    B, _, N = node_features.shape
    BN = B * N
    E = edge_index.shape[2]

    # --- feature assembly (matches torch.stack(..., dim=2).reshape(B*N, 3)) ---
    nf = jnp.squeeze(node_features.astype(jnp.float32), axis=1)           # (B, N)
    x0 = jnp.stack(
        (actions[:, :, 0].astype(jnp.float32),
         actions[:, :, 1].astype(jnp.float32),
         nf),
        axis=2,
    ).reshape(BN, 3)
    x0 = jnp.pad(x0, ((0, 0), (0, in_pad - 3)))                           # lane-pad 3 -> in_pad

    # --- batched edge_index exactly as the module builds it (per-graph offset + reshape) ---
    offsets = (jnp.arange(B, dtype=edge_index.dtype) * N).reshape(B, 1, 1)
    ei = (edge_index + offsets).reshape(2, B * E)
    row, col = ei[0], ei[1]

    # --- GCNConv gcn_norm: add self loops + symmetric normalization -> dense adjacency ---
    loops = jnp.arange(BN, dtype=row.dtype)
    row_f = jnp.concatenate([row, loops])
    col_f = jnp.concatenate([col, loops])
    w_f = jnp.ones(row_f.shape[0], jnp.float32)
    deg = jnp.zeros((BN,), jnp.float32).at[col_f].add(w_f)                # in-degree (w/ loops)
    dis = jnp.where(deg > 0.0, jax.lax.rsqrt(deg), 0.0)
    norm = dis[row_f] * dis[col_f]
    adj = jnp.zeros((BN, BN), jnp.float32).at[col_f, row_f].add(norm)     # aggregate at target

    # --- global_add_pool membership matrix (B, BN) ---
    batch_vec = jnp.repeat(jnp.arange(B, dtype=jnp.int32), N)
    pool = (batch_vec[None, :] ==
            jnp.arange(B, dtype=jnp.int32)[:, None]).astype(jnp.float32)
    return x0, adj, pool


def gcn_critic_forward(actions, node_features, edge_index, params, *, num_nodes_out):
    """actions: (B, N, 2), node_features: (B, 1, N) f32, edge_index: (B, 2, E) i32."""
    conv_w = params["conv_w"]        # list of (in[, padded], out)
    conv_b = params["conv_b"]        # list of (1, out)
    mlp_w = params["mlp_w"]          # list of (in, out)
    mlp_b = params["mlp_b"]
    out_w = params["out_w"]          # (hidden, OUT_PAD)  (columns >= num_nodes are zero)
    out_b = params["out_b"]          # (1, OUT_PAD)

    B = node_features.shape[0]
    N = node_features.shape[2]
    BN = B * N
    in_pad = conv_w[0].shape[0]

    x0, adj, pool = _preprocess(actions, node_features, edge_index, in_pad)

    inputs = [x0, adj, pool]
    for w, b in zip(conv_w, conv_b):
        inputs += [w, b]
    for w, b in zip(mlp_w, mlp_b):
        inputs += [w, b]
    inputs += [out_w, out_b]

    out_pad = out_w.shape[1]

    # Advisory cost estimate so XLA can schedule around the custom call.
    flops = 0
    for w in conv_w:
        flops += 2 * BN * w.shape[0] * w.shape[1]          # x @ Wc
        flops += 2 * BN * BN * w.shape[1]                  # A_hat @ (x Wc)
    flops += 2 * B * BN * conv_w[-1].shape[1]              # pooling matmul
    for w in mlp_w:
        flops += 2 * B * w.shape[0] * w.shape[1]
    flops += 2 * B * out_w.shape[0] * out_w.shape[1]
    bytes_accessed = sum(int(a.size) * a.dtype.itemsize for a in inputs) + B * out_pad * 4
    cost = pl.CostEstimate(
        flops=int(flops),
        transcendentals=int(B * out_pad),
        bytes_accessed=int(bytes_accessed),
    )

    kernel = functools.partial(_gcn_critic_kernel, len(conv_w), len(mlp_w))
    vmem_spec = pl.BlockSpec(memory_space=pltpu.MemorySpace.VMEM)
    out = pl.pallas_call(
        kernel,
        out_shape=jax.ShapeDtypeStruct((B, out_pad), jnp.float32),
        in_specs=[vmem_spec] * len(inputs),
        out_specs=vmem_spec,
        cost_estimate=cost,
        compiler_params=pltpu.CompilerParams(vmem_limit_bytes=32 * 1024 * 1024),
    )(*inputs)
    return out[:, :num_nodes_out]


def _reference_forward(actions, node_features, edge_index, params, num_nodes_out):
    """Plain-XLA reference using the identical dense formulation (for a correctness check)."""
    in_pad = params["conv_w"][0].shape[0]
    x, adj, pool = _preprocess(actions, node_features, edge_index, in_pad)
    for w, b in zip(params["conv_w"], params["conv_b"]):
        x = jnp.maximum(adj @ (x @ w) + b, 0.0)
    x = pool @ x
    for w, b in zip(params["mlp_w"], params["mlp_b"]):
        x = jnp.maximum(x @ w + b, 0.0)
    x = x @ params["out_w"] + params["out_b"]
    return jax.nn.sigmoid(x)[:, :num_nodes_out]


def _linear_params(key, fan_in, fan_out, pad_rows=0, pad_cols=0):
    """Uniform init (PyTorch-Linear-style); zero padding keeps the math exact."""
    k1, k2 = jax.random.split(key)
    bound = 1.0 / math.sqrt(fan_in)
    w = jax.random.uniform(k1, (fan_in, fan_out), jnp.float32, -bound, bound)
    b = jax.random.uniform(k2, (1, fan_out), jnp.float32, -bound, bound)
    if pad_rows:
        w = jnp.pad(w, ((0, pad_rows), (0, 0)))
    if pad_cols:
        w = jnp.pad(w, ((0, 0), (0, pad_cols)))
        b = jnp.pad(b, ((0, 0), (0, pad_cols)))
    return w, b


if __name__ == "__main__":
    # Small config consistent with the module's __init__ / forward (batch >= 3 branch).
    embed_size = 8
    hidden_size = 32
    num_nodes = 16
    num_conv_layers = 3
    num_mlp_layers = 2
    batch = 4
    num_edges = 32
    IN_PAD = 8      # lane-pad the 3 raw node features
    OUT_PAD = 128   # lane-dense output width (sliced back to num_nodes)

    key = jax.random.PRNGKey(0)
    keys = jax.random.split(key, 16)

    # Conv stack: GCNConv(3, hidden), GCNConv(hidden, hidden), GCNConv(hidden, embed).
    conv_in = [3] + [hidden_size] * (num_conv_layers - 1)
    conv_out = [hidden_size] * (num_conv_layers - 1) + [embed_size]
    conv_w, conv_b = [], []
    for i in range(num_conv_layers):
        pad_rows = (IN_PAD - conv_in[i]) if i == 0 else 0
        w, b = _linear_params(keys[i], conv_in[i], conv_out[i], pad_rows=pad_rows)
        conv_w.append(w)
        conv_b.append(b)

    # MLP stack: Linear(embed, hidden), Linear(hidden, hidden).
    mlp_in = [embed_size] + [hidden_size] * (num_mlp_layers - 1)
    mlp_out = [hidden_size] * num_mlp_layers
    mlp_w, mlp_b = [], []
    for i in range(num_mlp_layers):
        w, b = _linear_params(keys[4 + i], mlp_in[i], mlp_out[i])
        mlp_w.append(w)
        mlp_b.append(b)

    out_w, out_b = _linear_params(
        keys[8], hidden_size, num_nodes, pad_cols=OUT_PAD - num_nodes)

    params = {
        "conv_w": conv_w,
        "conv_b": conv_b,
        "mlp_w": mlp_w,
        "mlp_b": mlp_b,
        "out_w": out_w,
        "out_b": out_b,
    }

    # Deterministic example inputs.
    actions = jax.random.randint(
        keys[10], (batch, num_nodes, 2), 0, 2, dtype=jnp.int32
    ).astype(jnp.float32)
    node_features = jax.random.normal(
        keys[11], (batch, 1, num_nodes), jnp.float32)
    edge_index = jax.random.randint(
        keys[12], (batch, 2, num_edges), 0, num_nodes, dtype=jnp.int32)

    fwd = jax.jit(functools.partial(gcn_critic_forward, num_nodes_out=num_nodes))
    out = jax.block_until_ready(fwd(actions, node_features, edge_index, params))

    assert out.shape == (batch, num_nodes), out.shape
    assert bool(jnp.all((out >= 0.0) & (out <= 1.0)))

    ref = _reference_forward(actions, node_features, edge_index, params, num_nodes)
    assert bool(jnp.allclose(out, ref, atol=1e-5, rtol=1e-5)), "mismatch vs XLA reference"

    print("KERNEL_OK")
</pallas_src>

<mosaic_0001>
module attributes {stable_mosaic.version = 11 : i64} {
  func.func private @main(%arg0: i32) attributes {dimension_semantics = [#tpu.dimension_semantics<core_parallel>], iteration_bounds = array<i64: 2>, tpu.core_type = #tpu.core_type<sc_scalar_subcore>, window_params = []} {
    return
  }
}

module attributes {stable_mosaic.version = 11 : i64} {
  func.func private @main(%arg0: i32) attributes {dimension_semantics = [#tpu.dimension_semantics<core_parallel>], iteration_bounds = array<i64: 2>, tpu.core_type = #tpu.core_type<sc_scalar_subcore>, window_params = []} {
    return
  }
}

module attributes {stable_mosaic.version = 11 : i64} {
  func.func @_gcn_critic_kernel(%arg0: memref<64x8xf32, #tpu.memory_space<vmem>>, %arg1: memref<64x64xf32, #tpu.memory_space<vmem>>, %arg2: memref<4x64xf32, #tpu.memory_space<vmem>>, %arg3: memref<8x32xf32, #tpu.memory_space<vmem>>, %arg4: memref<1x32xf32, #tpu.memory_space<vmem>>, %arg5: memref<32x32xf32, #tpu.memory_space<vmem>>, %arg6: memref<1x32xf32, #tpu.memory_space<vmem>>, %arg7: memref<32x8xf32, #tpu.memory_space<vmem>>, %arg8: memref<1x8xf32, #tpu.memory_space<vmem>>, %arg9: memref<8x32xf32, #tpu.memory_space<vmem>>, %arg10: memref<1x32xf32, #tpu.memory_space<vmem>>, %arg11: memref<32x32xf32, #tpu.memory_space<vmem>>, %arg12: memref<1x32xf32, #tpu.memory_space<vmem>>, %arg13: memref<32x128xf32, #tpu.memory_space<vmem>>, %arg14: memref<1x128xf32, #tpu.memory_space<vmem>>, %arg15: memref<4x128xf32, #tpu.memory_space<vmem>>) attributes {dimension_semantics = [], scalar_prefetch = 0 : i64, scratch_operands = 0 : i64, tpu.core_type = #tpu.core_type<tc>} {
    %c0 = arith.constant 0 : index
    %c0_0 = arith.constant 0 : index
    %0 = vector.load %arg0[%c0, %c0_0] : memref<64x8xf32, #tpu.memory_space<vmem>>, vector<64x8xf32>
    %c0_1 = arith.constant 0 : index
    %c0_2 = arith.constant 0 : index
    %1 = vector.load %arg1[%c0_1, %c0_2] : memref<64x64xf32, #tpu.memory_space<vmem>>, vector<64x64xf32>
    %c0_3 = arith.constant 0 : index
    %c0_4 = arith.constant 0 : index
    %2 = vector.load %arg3[%c0_3, %c0_4] : memref<8x32xf32, #tpu.memory_space<vmem>>, vector<8x32xf32>
    %c0_5 = arith.constant 0 : index
    %c0_6 = arith.constant 0 : index
    %3 = vector.load %arg4[%c0_5, %c0_6] : memref<1x32xf32, #tpu.memory_space<vmem>>, vector<1x32xf32>
    %cst = arith.constant dense<0.000000e+00> : vector<64x32xf32>
    %4 = tpu.matmul %0, %2, %cst {dimension_numbers = #tpu.dot_dimension_numbers<[1], [0], [0], [1], [0, 0, 1, 1], [], []>} : vector<64x8xf32>, vector<8x32xf32>, vector<64x32xf32> -> vector<64x32xf32>
    %cst_7 = arith.constant dense<0.000000e+00> : vector<64x32xf32>
    %5 = tpu.matmul %1, %4, %cst_7 {dimension_numbers = #tpu.dot_dimension_numbers<[1], [0], [0], [1], [0, 0, 1, 1], [], []>} : vector<64x64xf32>, vector<64x32xf32>, vector<64x32xf32> -> vector<64x32xf32>
    %6 = vector.broadcast %3 : vector<1x32xf32> to vector<64x32xf32>
    %7 = arith.addf %5, %6 : vector<64x32xf32>
    %cst_8 = arith.constant 0.000000e+00 : f32
    %8 = vector.broadcast %cst_8 : f32 to vector<64x32xf32>
    %9 = arith.maximumf %7, %8 : vector<64x32xf32>
    %c0_9 = arith.constant 0 : index
    %c0_10 = arith.constant 0 : index
    %10 = vector.load %arg5[%c0_9, %c0_10] : memref<32x32xf32, #tpu.memory_space<vmem>>, vector<32x32xf32>
    %c0_11 = arith.constant 0 : index
    %c0_12 = arith.constant 0 : index
    %11 = vector.load %arg6[%c0_11, %c0_12] : memref<1x32xf32, #tpu.memory_space<vmem>>, vector<1x32xf32>
    %cst_13 = arith.constant dense<0.000000e+00> : vector<64x32xf32>
    %12 = tpu.matmul %9, %10, %cst_13 {dimension_numbers = #tpu.dot_dimension_numbers<[1], [0], [0], [1], [0, 0, 1, 1], [], []>} : vector<64x32xf32>, vector<32x32xf32>, vector<64x32xf32> -> vector<64x32xf32>
    %cst_14 = arith.constant dense<0.000000e+00> : vector<64x32xf32>
    %13 = tpu.matmul %1, %12, %cst_14 {dimension_numbers = #tpu.dot_dimension_numbers<[1], [0], [0], [1], [0, 0, 1, 1], [], []>} : vector<64x64xf32>, vector<64x32xf32>, vector<64x32xf32> -> vector<64x32xf32>
    %14 = vector.broadcast %11 : vector<1x32xf32> to vector<64x32xf32>
    %15 = arith.addf %13, %14 : vector<64x32xf32>
    %cst_15 = arith.constant 0.000000e+00 : f32
    %16 = vector.broadcast %cst_15 : f32 to vector<64x32xf32>
    %17 = arith.maximumf %15, %16 : vector<64x32xf32>
    %c0_16 = arith.constant 0 : index
    %c0_17 = arith.constant 0 : index
    %18 = vector.load %arg7[%c0_16, %c0_17] : memref<32x8xf32, #tpu.memory_space<vmem>>, vector<32x8xf32>
    %c0_18 = arith.constant 0 : index
    %c0_19 = arith.constant 0 : index
    %19 = vector.load %arg8[%c0_18, %c0_19] : memref<1x8xf32, #tpu.memory_space<vmem>>, vector<1x8xf32>
    %cst_20 = arith.constant dense<0.000000e+00> : vector<64x8xf32>
    %20 = tpu.matmul %17, %18, %cst_20 {dimension_numbers = #tpu.dot_dimension_numbers<[1], [0], [0], [1], [0, 0, 1, 1], [], []>} : vector<64x32xf32>, vector<32x8xf32>, vector<64x8xf32> -> vector<64x8xf32>
    %cst_21 = arith.constant dense<0.000000e+00> : vector<64x8xf32>
    %21 = tpu.matmul %1, %20, %cst_21 {dimension_numbers = #tpu.dot_dimension_numbers<[1], [0], [0], [1], [0, 0, 1, 1], [], []>} : vector<64x64xf32>, vector<64x8xf32>, vector<64x8xf32> -> vector<64x8xf32>
    %22 = vector.broadcast %19 : vector<1x8xf32> to vector<64x8xf32>
    %23 = arith.addf %21, %22 : vector<64x8xf32>
    %cst_22 = arith.constant 0.000000e+00 : f32
    %24 = vector.broadcast %cst_22 : f32 to vector<64x8xf32>
    %25 = arith.maximumf %23, %24 : vector<64x8xf32>
    %c0_23 = arith.constant 0 : index
    %c0_24 = arith.constant 0 : index
    %26 = vector.load %arg2[%c0_23, %c0_24] : memref<4x64xf32, #tpu.memory_space<vmem>>, vector<4x64xf32>
    %cst_25 = arith.constant dense<0.000000e+00> : vector<4x8xf32>
    %27 = tpu.matmul %26, %25, %cst_25 {dimension_numbers = #tpu.dot_dimension_numbers<[1], [0], [0], [1], [0, 0, 1, 1], [], []>} : vector<4x64xf32>, vector<64x8xf32>, vector<4x8xf32> -> vector<4x8xf32>
    %c0_26 = arith.constant 0 : index
    %c0_27 = arith.constant 0 : index
    %28 = vector.load %arg9[%c0_26, %c0_27] : memref<8x32xf32, #tpu.memory_space<vmem>>, vector<8x32xf32>
    %c0_28 = arith.constant 0 : index
    %c0_29 = arith.constant 0 : index
    %29 = vector.load %arg10[%c0_28, %c0_29] : memref<1x32xf32, #tpu.memory_space<vmem>>, vector<1x32xf32>
    %cst_30 = arith.constant dense<0.000000e+00> : vector<4x32xf32>
    %30 = tpu.matmul %27, %28, %cst_30 {dimension_numbers = #tpu.dot_dimension_numbers<[1], [0], [0], [1], [0, 0, 1, 1], [], []>} : vector<4x8xf32>, vector<8x32xf32>, vector<4x32xf32> -> vector<4x32xf32>
    %31 = vector.broadcast %29 : vector<1x32xf32> to vector<4x32xf32>
    %32 = arith.addf %30, %31 : vector<4x32xf32>
    %cst_31 = arith.constant 0.000000e+00 : f32
    %33 = vector.broadcast %cst_31 : f32 to vector<4x32xf32>
    %34 = arith.maximumf %32, %33 : vector<4x32xf32>
    %c0_32 = arith.constant 0 : index
    %c0_33 = arith.constant 0 : index
    %35 = vector.load %arg11[%c0_32, %c0_33] : memref<32x32xf32, #tpu.memory_space<vmem>>, vector<32x32xf32>
    %c0_34 = arith.constant 0 : index
    %c0_35 = arith.constant 0 : index
    %36 = vector.load %arg12[%c0_34, %c0_35] : memref<1x32xf32, #tpu.memory_space<vmem>>, vector<1x32xf32>
    %cst_36 = arith.constant dense<0.000000e+00> : vector<4x32xf32>
    %37 = tpu.matmul %34, %35, %cst_36 {dimension_numbers = #tpu.dot_dimension_numbers<[1], [0], [0], [1], [0, 0, 1, 1], [], []>} : vector<4x32xf32>, vector<32x32xf32>, vector<4x32xf32> -> vector<4x32xf32>
    %38 = vector.broadcast %36 : vector<1x32xf32> to vector<4x32xf32>
    %39 = arith.addf %37, %38 : vector<4x32xf32>
    %cst_37 = arith.constant 0.000000e+00 : f32
    %40 = vector.broadcast %cst_37 : f32 to vector<4x32xf32>
    %41 = arith.maximumf %39, %40 : vector<4x32xf32>
    %c0_38 = arith.constant 0 : index
    %c0_39 = arith.constant 0 : index
    %42 = vector.load %arg13[%c0_38, %c0_39] : memref<32x128xf32, #tpu.memory_space<vmem>>, vector<32x128xf32>
    %c0_40 = arith.constant 0 : index
    %c0_41 = arith.constant 0 : index
    %43 = vector.load %arg14[%c0_40, %c0_41] : memref<1x128xf32, #tpu.memory_space<vmem>>, vector<1x128xf32>
    %cst_42 = arith.constant dense<0.000000e+00> : vector<4x128xf32>
    %44 = tpu.matmul %41, %42, %cst_42 {dimension_numbers = #tpu.dot_dimension_numbers<[1], [0], [0], [1], [0, 0, 1, 1], [], []>} : vector<4x32xf32>, vector<32x128xf32>, vector<4x128xf32> -> vector<4x128xf32>
    %45 = vector.broadcast %43 : vector<1x128xf32> to vector<4x128xf32>
    %46 = arith.addf %44, %45 : vector<4x128xf32>
    %47 = arith.negf %46 : vector<4x128xf32>
    %48 = math.exp %47 : vector<4x128xf32>
    %cst_43 = arith.constant 1.000000e+00 : f32
    %49 = vector.broadcast %cst_43 : f32 to vector<4x128xf32>
    %50 = arith.addf %49, %48 : vector<4x128xf32>
    %51 = arith.divf %49, %50 : vector<4x128xf32>
    %c0_44 = arith.constant 0 : index
    %c0_45 = arith.constant 0 : index
    %52 = vector.load %arg15[%c0_44, %c0_45] : memref<4x128xf32, #tpu.memory_space<vmem>>, vector<4x128xf32>
    tpu.vector_store %arg15[%c0_44, %c0_45], %51 {strides = array<i32>} : memref<4x128xf32, #tpu.memory_space<vmem>>, vector<4x128xf32>,
    return
  }
}

</mosaic_0001>

<bundles_post_ra>
// kernel: eq.8
= control target key start
LH: loop header
LB: loop body
LE: loop exit
PB: predicated region body
PF: predicated region fallthrough
CT: control target
= control target key end

     0   :  { %vm8_vm0 = vcmask 130048   ;;  %s40_s8 = smov 16   ;;  %s41_s9 = smov 32   ;;  %vm14_vm1 = vcmask 523648   ;;  %vm20_vm2 = vcmask 392448   ;;  %vm26_vm3 = vcmask 261248   ;;  %s58_s0 = inlined_call_operand.vmem [shape: s32[4,16], index: 0, kind: input, shape index: {}]   ;;  %s59_s1 = inlined_call_operand.vmem [shape: s32[64], index: 1, kind: output, shape index: {}]  }
   0x1   :  { %v5_v0 = vld [vmem:[%s58_s0] sm:$0xf]  ;;  %s39_s0 = smov 48  }
   0x2   :  { %6 = vst [vmem:[#allocation1] sm:$0xf] %v5_v0 }
   0x9   :  { %v11_v1 = vld [vmem:[#allocation1 + $0x3] sm:$0x1]   ;;  %v23_v2 = vld [vmem:[#allocation1 + $0x1] sm:$0x1]   ;;  %v7_v3 = vld [vmem:[#allocation1] sm:$0x1]  }
   0xa   :  { %12 = vrot.lane.b32.xlu0 %v11_v1, %s39_s0  ;;  %24 = vrot.lane.b32.xlu1 %v23_v2, %s40_s8  ;;  %v17_v4 = vld [vmem:[#allocation1 + $0x2] sm:$0x1]   ;;  %9 = vst.msk [vmem:[#allocation0] sm:$0x1] %vm8_vm0, %v7_v3  }
   0xe   :  { %18 = vrot.lane.b32.xlu0 %v17_v4, %s41_s9 }
  0x7c   :  { %v13_v5 = vpop.permute.xlu0 %12   ;;  %v25_v6 = vpop.permute.xlu1 %24  }
  0x7d   :  { %15 = vst.msk [vmem:[#allocation0] sm:$0x1] %vm14_vm1, %v13_v5  }
  0x80   :  { %v19_v7 = vpop.permute.xlu0 %18  }
  0x81   :  { %21 = vst.msk [vmem:[#allocation0] sm:$0x1] %vm20_vm2, %v19_v7  }
  0x82   :  { %27 = vst.msk [vmem:[#allocation0] sm:$0x1] %vm26_vm3, %v25_v6  }
  0x89   :  { %v32_v8 = vld [vmem:[#allocation0] sm:$0x1] }
  0x8a   :  { %35 = vst [vmem:[%s59_s1] sm:$0x1] %v32_v8 }

// kernel: mul.3
= control target key start
LH: loop header
LB: loop body
LE: loop exit
PB: predicated region body
PF: predicated region fallthrough
CT: control target
= control target key end

     0   :  { %s34_s0 = inlined_call_operand.vmem [shape: f32[192], index: 0, kind: input, shape index: {}]   ;;  %s35_s1 = inlined_call_operand.vmem [shape: f32[192], index: 1, kind: input, shape index: {}]   ;;  %s36_s2 = inlined_call_operand.vmem [shape: f32[192], index: 2, kind: output, shape index: {}]  }
   0x1   :  { %v3_v0 = vld [vmem:[%s34_s0] sm:$0x3] }
   0x2   :  { %v4_v1 = vld [vmem:[%s35_s1] sm:$0x3] }
   0x3   :  { %v7_v2 = vmul.f32 %v4_v1, %v3_v0 }
   0x5   :  { %9 = vst [vmem:[%s36_s2] sm:$0x3] %v7_v2 }

// kernel: gcn_critic_forward.1
= control target key start
LH: loop header
LB: loop body
LE: loop exit
PB: predicated region body
PF: predicated region fallthrough
CT: control target
= control target key end

     0   :  { %20 = vsyncpa [#allocation3], 0  ;;  %s1918_s0 = inlined_call_operand.vmem [shape: f32[64,8], index: 0, kind: input, shape index: {}]   ;;  %s1919_s1 = inlined_call_operand.hbm [shape: f32[64,64], index: 1, kind: input, shape index: {}]   ;;  %s1920_s2 = inlined_call_operand.vmem [shape: f32[4,64], index: 2, kind: input, shape index: {}]   ;;  %s1921_s3 = inlined_call_operand.vmem [shape: f32[8,32], index: 3, kind: input, shape index: {}]   ;;  %s1922_s4 = inlined_call_operand.vmem [shape: f32[1,32], index: 4, kind: input, shape index: {}]   ;;  %s1923_s5 = inlined_call_operand.vmem [shape: f32[32,32], index: 5, kind: input, shape index: {}]   ;;  %s1924_s6 = inlined_call_operand.vmem [shape: f32[1,32], index: 6, kind: input, shape index: {}]   ;;  %s1925_s7 = inlined_call_operand.vmem [shape: f32[32,8], index: 7, kind: input, shape index: {}]   ;;  %s1926_s8 = inlined_call_operand.vmem [shape: f32[1,8], index: 8, kind: input, shape index: {}]   ;;  %s1927_s9 = inlined_call_operand.vmem [shape: f32[8,32], index: 9, kind: input, shape index: {}]   ;;  %s1928_s10 = inlined_call_operand.vmem [shape: f32[1,32], index: 10, kind: input, shape index: {}]   ;;  %s1929_s11 = inlined_call_operand.vmem [shape: f32[32,32], index: 11, kind: input, shape index: {}]   ;;  %s1930_s12 = inlined_call_operand.vmem [shape: f32[1,32], index: 12, kind: input, shape index: {}]   ;;  %s1931_s13 = inlined_call_operand.vmem [shape: f32[32,128], index: 13, kind: input, shape index: {}]   ;;  %s1932_s14 = inlined_call_operand.vmem [shape: f32[1,128], index: 14, kind: input, shape index: {}]   ;;  %s1933_s15 = inlined_call_operand.hbm [shape: f32[4,128], index: 15, kind: output, shape index: {}]  }
   0x1   :  { %21 = vsyncpa [#allocation4], 0  ;;  %s1610_s18 = smov [#allocation2]  }
   0x2   :  { %s29_s19 = sshll.u32 %s1610_s18, 4  ;;  %s30_s19 = int_to_ptr.vmem [resolvable:$true] %s29_s19 }
   0x3   :  { %s1574_s20 = scalar_lea.vmem %s30_s19, 1024  ;;  %p1579_p1 = scmp.lt.s32.totalorder %s30_s19, %s30_s19 }
   0x4   :  { %p1575_p0 = scmp.ne.s32.totalorder %s30_s19, %s1574_s20  ;;  %p1580_p2 = scmp.lt.s32.totalorder %s1574_s20, %s1574_s20 }
   0x6   :  { %p1581_p3 = por %p1580_p2, %p1579_p1 }
   0x8   :  { %p1582_p4 = pnand %p1581_p3, %p1575_p0 }
   0xa   :  { %1585 = shalt.err (!%p1582_p4)
}
   0xb   :  { %s1611_s21 = smov 128   ;;  %s1612_s22 = smov 8  }
   0xc   :  { %35 = dma.hbm_to_vmem [thread:$0]  %s1919_s1, 1024, %s30_s19, [#allocation3], %s1611_s21, %s1611_s21, %s1612_s22  }
   0xd   :  { %1606 = dma.done.wait [#allocation3], 1024  }
   0xe   :  { %1607 = vsyncadd [#allocation3], 4294966272  ;;  %vm83_vm0 = vcmask 64512   ;;  %v81_v0 = vld [vmem:[%s1921_s3] sm:$0xff]  ;;  %v66_v2 = vld [vmem:[%s1918_s0 + $0x8] sm:$0xff]  ;;  %vm219_vm1 = vcmask 523264  }
   0xf   :  { %v65_v1 = vld [vmem:[%s1918_s0] sm:$0xff]  ;;  %1372 = vmatprep.subr.mxu0 %v81_v0  ;;  %v67_v3 = vld [vmem:[%s1918_s0 + $0x10] sm:$0xff]  ;;  %v68_v4 = vld [vmem:[%s1918_s0 + $0x18] sm:$0xff]  ;;  %vm362_vm2 = vcmask 261120   ;;  %vm1614_vm3 = vmmov 0  }
  0x10   :  { %1374 = vmatprep.mubr.msk.f32.mxu0 %vm83_vm0, %v65_v1  ;;  %1373 = vmatpush3.msra.mxu0 %v81_v0  ;;  %v69_v5 = vld [vmem:[%s1918_s0 + $0x20] sm:$0xff]  ;;  %v70_v6 = vld [vmem:[%s1918_s0 + $0x28] sm:$0xff]  ;;  %v71_v7 = vld [vmem:[%s1918_s0 + $0x30] sm:$0xff] }
  0x11   :  { %1375 = vmatmul.mubr.msk.f32.vlgmr.msra.gmra.mxu0 %vm83_vm0, %v66_v2  ;;  %v72_v8 = vld [vmem:[%s1918_s0 + $0x38] sm:$0xff]  ;;  %v1734_v9 = vld [vmem:[#allocation2] sm:$0xff]  ;;  %v359_v11 = vld [vmem:[%s1923_s5 + $0x10] sm:$0xff] }
  0x12   :  { %1377 = vmatprep.mubr.msk.f32.mxu0 %vm83_vm0, %v67_v3  ;;  %1402 = vmatprep.mubr.msk.f32.mxu1 %vm219_vm1, %v1734_v9  ;;  %v360_v10 = vld [vmem:[%s1923_s5 + $0x18] sm:$0xff]  ;;  %v1744_v20 = vld [vmem:[#allocation2 + $0x8] sm:$0xff]  ;;  %v1746_v21 = vld [vmem:[#allocation2 + $0x10] sm:$0xff] }
  0x13   :  { %1414 = vmatprep.subr.mxu0 %v360_v10  ;;  %v1752_v22 = vld [vmem:[#allocation2 + $0x18] sm:$0xff]  ;;  %v1754_v23 = vld [vmem:[#allocation2 + $0x20] sm:$0xff]  ;;  %v1760_v24 = vld [vmem:[#allocation2 + $0x28] sm:$0xff] }
  0x14   :  { %1415 = vmatpush3.msra.mxu0 %v360_v10  ;;  %v1762_v25 = vld [vmem:[#allocation2 + $0x30] sm:$0xff]  ;;  %v1768_v26 = vld [vmem:[#allocation2 + $0x38] sm:$0xff]  ;;  %v358_v27 = vld [vmem:[%s1923_s5 + $0x8] sm:$0xff] }
  0x15   :  { %1378 = vmatmul.mubr.msk.f32.gmra.mxu0 %vm83_vm0, %v68_v4  ;;  %1416 = vmatprep.subr.mxu0 %v359_v11  ;;  %v357_v28 = vld [vmem:[%s1923_s5] sm:$0xff]  ;;  %v614_v54 = vld [vmem:[%s1925_s7 + $0x18] sm:$0xff]  ;;  %v613_v55 = vld [vmem:[%s1925_s7 + $0x10] sm:$0xff] }
  0x16   :  { %1380 = vmatprep.mubr.msk.f32.mxu0 %vm83_vm0, %v69_v5  ;;  %1417 = vmatpush3.msra.mxu0 %v359_v11  ;;  %v1219_v29 = vld [vmem:[%s1922_s4] ss:$0 sm:$0xff]  ;;  %v612_v0 = vld [vmem:[%s1925_s7 + $0x8] sm:$0xff] }
  0x17   :  { %1418 = vmatprep.subr.mxu0 %v358_v27  ;;  %v611_v1 = vld [vmem:[%s1925_s7] sm:$0xff] }
  0x18   :  { %1419 = vmatpush3.msra.mxu0 %v358_v27  ;;  %v1236_v2 = vld [vmem:[%s1924_s6] ss:$0 sm:$0xff] }
  0x19   :  { %1381 = vmatmul.mubr.msk.f32.gmra.mxu0 %vm83_vm0, %v70_v6  ;;  %1420 = vmatprep.subr.mxu0 %v357_v28 }
  0x1a   :  { %1383 = vmatprep.mubr.msk.f32.mxu0 %vm83_vm0, %v71_v7  ;;  %1421 = vmatpush3.msra.mxu0 %v357_v28 }
  0x1b   :  { %1462 = vmatprep.subr.mxu0 %v614_v54 }
  0x1d   :  { %1384 = vmatmul.mubr.msk.f32.gmra.mxu0 %vm83_vm0, %v72_v8 }
  0xd1   :  { %v1376_v12 = vpop.f32.mrf.mxu0 }
  0xd3   :  { %v174_v13 = vpop.f32.mrf.mxu0 }
  0xd5   :  { %v1379_v14 = vpop.f32.mrf.mxu0 }
  0xd7   :  { %v184_v15 = vpop.f32.mrf.mxu0 }
  0xd9   :  { %v1382_v16 = vpop.f32.mrf.mxu0 }
  0xdb   :  { %v194_v17 = vpop.f32.mrf.mxu0 }
  0xdd   :  { %v1385_v18 = vpop.f32.mrf.mxu0 }
  0xde   :  { %1386 = vmatprep.subr.mxu1 %v1385_v18 }
  0xdf   :  { %v204_v19 = vpop.f32.mrf.mxu0  ;;  %1387 = vmatpush3.msra.mxu1 %v1385_v18 }
  0xe0   :  { %1388 = vmatprep.subr.mxu1 %v204_v19 }
  0xe1   :  { %1389 = vmatpush3.msra.mxu1 %v204_v19 }
  0xe2   :  { %1390 = vmatprep.subr.mxu1 %v1382_v16 }
  0xe3   :  { %1391 = vmatpush3.msra.mxu1 %v1382_v16 }
  0xe4   :  { %1392 = vmatprep.subr.mxu1 %v194_v17 }
  0xe5   :  { %1393 = vmatpush3.msra.mxu1 %v194_v17 }
  0xe6   :  { %1394 = vmatprep.subr.mxu1 %v1379_v14 }
  0xe7   :  { %1395 = vmatpush3.msra.mxu1 %v1379_v14 }
  0xe8   :  { %1396 = vmatprep.subr.mxu1 %v184_v15 }
  0xe9   :  { %1397 = vmatpush3.msra.mxu1 %v184_v15 }
  0xea   :  { %1398 = vmatprep.subr.mxu1 %v1376_v12 }
  0xeb   :  { %1399 = vmatpush3.msra.mxu1 %v1376_v12 }
  0xec   :  { %1400 = vmatprep.subr.mxu1 %v174_v13 }
  0xed   :  { %1401 = vmatpush3.msra.mxu1 %v174_v13 }
  0xee   :  { %1403 = vmatmul.mubr.msk.f32.vlgmr.msra.gmra.mxu1 %vm219_vm1, %v1744_v20 }
  0xef   :  { %1405 = vmatprep.mubr.msk.f32.mxu1 %vm219_vm1, %v1746_v21 }
  0xf2   :  { %1406 = vmatmul.mubr.msk.f32.gmra.mxu1 %vm219_vm1, %v1752_v22 }
  0xf3   :  { %1408 = vmatprep.mubr.msk.f32.mxu1 %vm219_vm1, %v1754_v23 }
  0xf6   :  { %1409 = vmatmul.mubr.msk.f32.gmra.mxu1 %vm219_vm1, %v1760_v24 }
  0xf7   :  { %1411 = vmatprep.mubr.msk.f32.mxu1 %vm219_vm1, %v1762_v25 }
  0xfa   :  { %1412 = vmatmul.mubr.msk.f32.gmra.mxu1 %vm219_vm1, %v1768_v26 }
  0xfb   :  { %1450 = vmatprep.mubr.msk.f32.mxu1 %vm219_vm1, %v1734_v9 }
 0x1ae   :  { %v1404_v30 = vpop.f32.mrf.mxu1 }
 0x1af   :  { %v316_v31 = vadd.f32 %v1404_v30, %v1219_v29 }
 0x1b0   :  { %v310_v32 = vpop.f32.mrf.mxu1 }
 0x1b1   :  { %v311_v33 = vadd.f32 %v1219_v29, %v310_v32  ;;  %v350_v36 = vmax.f32 %v316_v31, 0.0 }
 0x1b2   :  { %v1407_v34 = vpop.f32.mrf.mxu1 }
 0x1b3   :  { %v349_v35 = vmax.f32 %v311_v33, 0.0  ;;  %v326_v37 = vadd.f32 %v1407_v34, %v1219_v29 }
 0x1b4   :  { %v320_v38 = vpop.f32.mrf.mxu1 }
 0x1b5   :  { %v321_v39 = vadd.f32 %v1219_v29, %v320_v38  ;;  %1422 = vmatprep.mubr.msk.f32.mxu0 %vm362_vm2, %v349_v35  ;;  %v352_v42 = vmax.f32 %v326_v37, 0.0 }
 0x1b6   :  { %v1410_v40 = vpop.f32.mrf.mxu1  ;;  %1423 = vmatmul.mubr.msk.f32.vlgmr.msra.gmra.mxu0 %vm362_vm2, %v350_v36 }
 0x1b7   :  { %v351_v41 = vmax.f32 %v321_v39, 0.0  ;;  %v336_v43 = vadd.f32 %v1410_v40, %v1219_v29  ;;  %1463 = vmatpush3.msra.mxu0 %v614_v54 }
 0x1b8   :  { %v330_v44 = vpop.f32.mrf.mxu1  ;;  %1464 = vmatprep.subr.mxu0 %v613_v55 }
 0x1b9   :  { %v331_v45 = vadd.f32 %v1219_v29, %v330_v44  ;;  %1425 = vmatprep.mubr.msk.f32.mxu0 %vm362_vm2, %v351_v41  ;;  %v354_v48 = vmax.f32 %v336_v43, 0.0  ;;  %1465 = vmatpush3.msra.mxu0 %v613_v55 }
 0x1ba   :  { %v1413_v46 = vpop.f32.mrf.mxu1  ;;  %1426 = vmatmul.mubr.msk.f32.gmra.mxu0 %vm362_vm2, %v352_v42  ;;  %1466 = vmatprep.subr.mxu0 %v612_v0  ;;  %v1613_v42 = vmov 0.0  }
 0x1bb   :  { %v353_v47 = vmax.f32 %v331_v45, 0.0  ;;  %v346_v49 = vadd.f32 %v1413_v46, %v1219_v29  ;;  %1467 = vmatpush3.msra.mxu0 %v612_v0 }
 0x1bc   :  { %v340_v50 = vpop.f32.mrf.mxu1  ;;  %1468 = vmatprep.subr.mxu0 %v611_v1 }
 0x1bd   :  { %v341_v51 = vadd.f32 %v1219_v29, %v340_v50  ;;  %1428 = vmatprep.mubr.msk.f32.mxu0 %vm362_vm2, %v353_v47  ;;  %v356_v53 = vmax.f32 %v346_v49, 0.0  ;;  %1469 = vmatpush3.msra.mxu0 %v611_v1 }
 0x1be   :  { %1429 = vmatmul.mubr.msk.f32.gmra.mxu0 %vm362_vm2, %v354_v48  ;;  %1510 = vmatprep.subr.mxu0 %v1613_v42 }
 0x1bf   :  { %v355_v52 = vmax.f32 %v341_v51, 0.0 }
 0x1c1   :  { %1431 = vmatprep.mubr.msk.f32.mxu0 %vm362_vm2, %v355_v52 }
 0x1c2   :  { %1432 = vmatmul.mubr.msk.f32.gmra.mxu0 %vm362_vm2, %v356_v53 }
 0x276   :  { %v1424_v56 = vpop.f32.mrf.mxu0 }
 0x278   :  { %v453_v57 = vpop.f32.mrf.mxu0 }
 0x27a   :  { %v1427_v58 = vpop.f32.mrf.mxu0 }
 0x27c   :  { %v463_v59 = vpop.f32.mrf.mxu0 }
 0x27e   :  { %v1430_v60 = vpop.f32.mrf.mxu0 }
 0x280   :  { %v473_v61 = vpop.f32.mrf.mxu0 }
 0x282   :  { %v1433_v62 = vpop.f32.mrf.mxu0 }
 0x283   :  { %1434 = vmatprep.subr.mxu1 %v1433_v62 }
 0x284   :  { %v483_v63 = vpop.f32.mrf.mxu0  ;;  %1435 = vmatpush3.msra.mxu1 %v1433_v62  ;;  %v938_v62 = vld [vmem:[%s1927_s9] sm:$0xff] }
 0x285   :  { %1436 = vmatprep.subr.mxu1 %v483_v63 }
 0x286   :  { %1437 = vmatpush3.msra.mxu1 %v483_v63  ;;  %v1023_v63 = vld [vmem:[%s1929_s11 + $0x18] sm:$0xff] }
 0x287   :  { %1438 = vmatprep.subr.mxu1 %v1430_v60 }
 0x288   :  { %1439 = vmatpush3.msra.mxu1 %v1430_v60 }
 0x289   :  { %1440 = vmatprep.subr.mxu1 %v473_v61 }
 0x28a   :  { %1441 = vmatpush3.msra.mxu1 %v473_v61  ;;  %v864_v61 = vld [vmem:[%s1920_s2] sm:$0xf] }
 0x28b   :  { %1442 = vmatprep.subr.mxu1 %v1427_v58 }
 0x28c   :  { %1443 = vmatpush3.msra.mxu1 %v1427_v58 }
 0x28d   :  { %1444 = vmatprep.subr.mxu1 %v463_v59 }
 0x28e   :  { %1445 = vmatpush3.msra.mxu1 %v463_v59 }
 0x28f   :  { %1446 = vmatprep.subr.mxu1 %v1424_v56 }
 0x290   :  { %1447 = vmatpush3.msra.mxu1 %v1424_v56 }
 0x291   :  { %1448 = vmatprep.subr.mxu1 %v453_v57 }
 0x292   :  { %1449 = vmatpush3.msra.mxu1 %v453_v57 }
 0x293   :  { %1451 = vmatmul.mubr.msk.f32.vlgmr.msra.gmra.mxu1 %vm219_vm1, %v1744_v20 }
 0x294   :  { %1453 = vmatprep.mubr.msk.f32.mxu1 %vm219_vm1, %v1746_v21 }
 0x297   :  { %1454 = vmatmul.mubr.msk.f32.gmra.mxu1 %vm219_vm1, %v1752_v22 }
 0x298   :  { %1456 = vmatprep.mubr.msk.f32.mxu1 %vm219_vm1, %v1754_v23 }
 0x29b   :  { %1457 = vmatmul.mubr.msk.f32.gmra.mxu1 %vm219_vm1, %v1760_v24 }
 0x29c   :  { %1459 = vmatprep.mubr.msk.f32.mxu1 %vm219_vm1, %v1762_v25 }
 0x29f   :  { %1460 = vmatmul.mubr.msk.f32.gmra.mxu1 %vm219_vm1, %v1768_v26 }
 0x2a0   :  { %1498 = vmatprep.mubr.msk.f32.mxu1 %vm219_vm1, %v1734_v9 }
 0x353   :  { %v1452_v3 = vpop.f32.mrf.mxu1 }
 0x354   :  { %v570_v4 = vadd.f32 %v1452_v3, %v1236_v2  ;;  %v1021_v3 = vld [vmem:[%s1929_s11 + $0x8] sm:$0xff] }
 0x355   :  { %v564_v5 = vpop.f32.mrf.mxu1 }
 0x356   :  { %v565_v6 = vadd.f32 %v1236_v2, %v564_v5  ;;  %v604_v9 = vmax.f32 %v570_v4, 0.0  ;;  %v1020_v4 = vld [vmem:[%s1929_s11] sm:$0xff]  ;;  %v1108_v5 = vld [vmem:[%s1931_s13 + $0x18] sm:$0xff] }
 0x357   :  { %v1455_v7 = vpop.f32.mrf.mxu1 }
 0x358   :  { %v603_v8 = vmax.f32 %v565_v6, 0.0  ;;  %v580_v10 = vadd.f32 %v1455_v7, %v1236_v2  ;;  %v1107_v6 = vld [vmem:[%s1931_s13 + $0x10] sm:$0xff]  ;;  %v1106_v7 = vld [vmem:[%s1931_s13 + $0x8] sm:$0xff] }
 0x359   :  { %v574_v11 = vpop.f32.mrf.mxu1 }
 0x35a   :  { %v575_v12 = vadd.f32 %v1236_v2, %v574_v11  ;;  %1470 = vmatprep.mubr.msk.f32.mxu0 %vm362_vm2, %v603_v8  ;;  %v606_v15 = vmax.f32 %v580_v10, 0.0  ;;  %v1263_v8 = vld [vmem:[%s1928_s10] ss:$0 sm:$0xff] }
 0x35b   :  { %v1458_v13 = vpop.f32.mrf.mxu1  ;;  %1471 = vmatmul.mubr.msk.f32.vlgmr.msra.gmra.mxu0 %vm362_vm2, %v604_v9 }
 0x35c   :  { %v605_v14 = vmax.f32 %v575_v12, 0.0  ;;  %v590_v16 = vadd.f32 %v1458_v13, %v1236_v2  ;;  %v1105_v13 = vld [vmem:[%s1931_s13] sm:$0xff]  ;;  %s1615_s13 = smov [#allocation5]  }
 0x35d   :  { %v584_v17 = vpop.f32.mrf.mxu1 }
 0x35e   :  { %v585_v18 = vadd.f32 %v1236_v2, %v584_v17  ;;  %1473 = vmatprep.mubr.msk.f32.mxu0 %vm362_vm2, %v605_v14  ;;  %v608_v28 = vmax.f32 %v590_v16, 0.0  ;;  %v1265_v14 = vld [vmem:[%s1930_s12] ss:$0 sm:$0xff]  ;;  %s1202_s12 = sshll.u32 %s1615_s13, 4  ;;  %s1203_s12 = int_to_ptr.vmem [resolvable:$true] %s1202_s12 }
 0x35f   :  { %v1461_v19 = vpop.f32.mrf.mxu1  ;;  %1474 = vmatmul.mubr.msk.f32.gmra.mxu0 %vm362_vm2, %v606_v15  ;;  %s1586_s7 = scalar_lea.vmem %s1203_s12, 64  ;;  %p1591_p6 = scmp.lt.s32.totalorder %s1203_s12, %s1203_s12 }
 0x360   :  { %v607_v27 = vmax.f32 %v585_v18, 0.0  ;;  %v600_v29 = vadd.f32 %v1461_v19, %v1236_v2  ;;  %v1267_v19 = vld [vmem:[%s1932_s14] ss:$0 sm:$0xff]  ;;  %p1587_p5 = scmp.ne.s32.totalorder %s1203_s12, %s1586_s7  ;;  %p1592_p7 = scmp.lt.s32.totalorder %s1586_s7, %s1586_s7 }
 0x361   :  { %v594_v30 = vpop.f32.mrf.mxu1 }
 0x362   :  { %v595_v31 = vadd.f32 %v1236_v2, %v594_v30  ;;  %1476 = vmatprep.mubr.msk.f32.mxu0 %vm362_vm2, %v607_v27  ;;  %v610_v33 = vmax.f32 %v600_v29, 0.0  ;;  %v1022_v2 = vld [vmem:[%s1929_s11 + $0x10] sm:$0xff]  ;;  %p1593_p8 = por %p1592_p7, %p1591_p6 }
 0x363   :  { %1477 = vmatmul.mubr.msk.f32.gmra.mxu0 %vm362_vm2, %v608_v28 }
 0x364   :  { %v609_v32 = vmax.f32 %v595_v31, 0.0  ;;  %p1594_p9 = pnand %p1593_p8, %p1587_p5 }
 0x366   :  { %1479 = vmatprep.mubr.msk.f32.mxu0 %vm362_vm2, %v609_v32 }
 0x367   :  { %1480 = vmatmul.mubr.msk.f32.gmra.mxu0 %vm362_vm2, %v610_v33 }
 0x368   :  { %1526 = vmatprep.mubr.msk.f32.mxu0 %vm1614_vm3, %v1613_v42 }
 0x41b   :  { %v1472_v34 = vpop.f32.mrf.mxu0 }
 0x41d   :  { %v706_v35 = vpop.f32.mrf.mxu0 }
 0x41f   :  { %v1475_v36 = vpop.f32.mrf.mxu0 }
 0x421   :  { %v716_v37 = vpop.f32.mrf.mxu0 }
 0x423   :  { %v1478_v38 = vpop.f32.mrf.mxu0 }
 0x425   :  { %v726_v39 = vpop.f32.mrf.mxu0 }
 0x427   :  { %v1481_v40 = vpop.f32.mrf.mxu0 }
 0x428   :  { %1482 = vmatprep.subr.mxu1 %v1481_v40 }
 0x429   :  { %v736_v41 = vpop.f32.mrf.mxu0  ;;  %1483 = vmatpush3.msra.mxu1 %v1481_v40 }
 0x42a   :  { %1484 = vmatprep.subr.mxu1 %v736_v41 }
 0x42b   :  { %1485 = vmatpush3.msra.mxu1 %v736_v41 }
 0x42c   :  { %1486 = vmatprep.subr.mxu1 %v1478_v38 }
 0x42d   :  { %1487 = vmatpush3.msra.mxu1 %v1478_v38 }
 0x42e   :  { %1488 = vmatprep.subr.mxu1 %v726_v39 }
 0x42f   :  { %1489 = vmatpush3.msra.mxu1 %v726_v39 }
 0x430   :  { %1490 = vmatprep.subr.mxu1 %v1475_v36 }
 0x431   :  { %1491 = vmatpush3.msra.mxu1 %v1475_v36 }
 0x432   :  { %1492 = vmatprep.subr.mxu1 %v716_v37 }
 0x433   :  { %1493 = vmatpush3.msra.mxu1 %v716_v37 }
 0x434   :  { %1494 = vmatprep.subr.mxu1 %v1472_v34 }
 0x435   :  { %1495 = vmatpush3.msra.mxu1 %v1472_v34 }
 0x436   :  { %1496 = vmatprep.subr.mxu1 %v706_v35 }
 0x437   :  { %1497 = vmatpush3.msra.mxu1 %v706_v35 }
 0x438   :  { %1499 = vmatmul.mubr.msk.f32.vlgmr.msra.gmra.mxu1 %vm219_vm1, %v1744_v20  ;;  %1545 = vmatprep.subr.mxu1 %v1613_v42 }
 0x439   :  { %1501 = vmatprep.mubr.msk.f32.mxu1 %vm219_vm1, %v1746_v21  ;;  %1546 = vmatpush3.msra.mxu1 %v1108_v5 }
 0x43a   :  { %1547 = vmatprep.subr.mxu1 %v1613_v42 }
 0x43b   :  { %1548 = vmatpush3.msra.mxu1 %v1107_v6 }
 0x43c   :  { %1502 = vmatmul.mubr.msk.f32.gmra.mxu1 %vm219_vm1, %v1752_v22  ;;  %1549 = vmatprep.subr.mxu1 %v1613_v42 }
 0x43d   :  { %1504 = vmatprep.mubr.msk.f32.mxu1 %vm219_vm1, %v1754_v23  ;;  %1550 = vmatpush3.msra.mxu1 %v1106_v7 }
 0x43e   :  { %1551 = vmatprep.subr.mxu1 %v1613_v42 }
 0x43f   :  { %1552 = vmatpush3.msra.mxu1 %v1105_v13 }
 0x440   :  { %1505 = vmatmul.mubr.msk.f32.gmra.mxu1 %vm219_vm1, %v1760_v24 }
 0x441   :  { %1507 = vmatprep.mubr.msk.f32.mxu1 %vm219_vm1, %v1762_v25 }
 0x444   :  { %1508 = vmatmul.mubr.msk.f32.gmra.mxu1 %vm219_vm1, %v1768_v26  ;;  %v1253_v26 = vld [vmem:[%s1926_s8] ss:$0 sm:$0xff] }
 0x445   :  { %1553 = vmatprep.mubr.msk.f32.mxu1 %vm1614_vm3, %v1613_v42 }
 0x4f8   :  { %v1500_v20 = vpop.f32.mrf.mxu1 }
 0x4f9   :  { %v823_v55 = vadd.f32 %v1500_v20, %v1253_v26 }
 0x4fa   :  { %v817_v21 = vpop.f32.mrf.mxu1 }
 0x4fb   :  { %v818_v57 = vadd.f32 %v1253_v26, %v817_v21  ;;  %v857_v59 = vmax.f32 %v823_v55, 0.0 }
 0x4fc   :  { %v1503_v22 = vpop.f32.mrf.mxu1 }
 0x4fd   :  { %v833_v51 = vadd.f32 %v1503_v22, %v1253_v26  ;;  %v856_v60 = vmax.f32 %v818_v57, 0.0 }
 0x4fe   :  { %v827_v23 = vpop.f32.mrf.mxu1 }
 0x4ff   :  { %v828_v53 = vadd.f32 %v1253_v26, %v827_v23  ;;  %v859_v56 = vmax.f32 %v833_v51, 0.0 }
 0x500   :  { %v1506_v24 = vpop.f32.mrf.mxu1 }
 0x501   :  { %v843_v46 = vadd.f32 %v1506_v24, %v1253_v26  ;;  %v858_v58 = vmax.f32 %v828_v53, 0.0 }
 0x502   :  { %v837_v25 = vpop.f32.mrf.mxu1 }
 0x503   :  { %v838_v49 = vadd.f32 %v1253_v26, %v837_v25  ;;  %v861_v52 = vmax.f32 %v843_v46, 0.0 }
 0x504   :  { %v1509_v43 = vpop.f32.mrf.mxu1 }
 0x505   :  { %v853_v44 = vadd.f32 %v1509_v43, %v1253_v26  ;;  %v860_v54 = vmax.f32 %v838_v49, 0.0 }
 0x506   :  { %v847_v45 = vpop.f32.mrf.mxu1 }
 0x507   :  { %v863_v47 = vmax.f32 %v853_v44, 0.0  ;;  %v848_v48 = vadd.f32 %v1253_v26, %v847_v45 }
 0x509   :  { %v862_v50 = vmax.f32 %v848_v48, 0.0  ;;  %1511 = vmatpush3.msra.mxu0 %v863_v47 }
 0x50a   :  { %1512 = vmatprep.subr.mxu0 %v1613_v42 }
 0x50b   :  { %1513 = vmatpush3.msra.mxu0 %v862_v50 }
 0x50c   :  { %1514 = vmatprep.subr.mxu0 %v1613_v42 }
 0x50d   :  { %1515 = vmatpush3.msra.mxu0 %v861_v52 }
 0x50e   :  { %1516 = vmatprep.subr.mxu0 %v1613_v42 }
 0x50f   :  { %1517 = vmatpush3.msra.mxu0 %v860_v54 }
 0x510   :  { %1518 = vmatprep.subr.mxu0 %v1613_v42 }
 0x511   :  { %1519 = vmatpush3.msra.mxu0 %v859_v56 }
 0x512   :  { %1520 = vmatprep.subr.mxu0 %v1613_v42 }
 0x513   :  { %1521 = vmatpush3.msra.mxu0 %v858_v58 }
 0x514   :  { %1522 = vmatprep.subr.mxu0 %v1613_v42 }
 0x515   :  { %1523 = vmatpush3.msra.mxu0 %v857_v59 }
 0x516   :  { %1524 = vmatprep.subr.mxu0 %v1613_v42 }
 0x517   :  { %1525 = vmatpush3.msra.mxu0 %v856_v60 }
 0x518   :  { %1527 = vmatmul.mubr.msk.f32.vlgmr.msra.gmra.mxu0 %vm219_vm1, %v864_v61  ;;  %1529 = vmatprep.subr.mxu0 %v1613_v42 }
 0x519   :  { %1530 = vmatpush3.msra.mxu0 %v938_v62  ;;  %1531 = vmatprep.mubr.msk.f32.mxu0 %vm1614_vm3, %v1613_v42 }
 0x51a   :  { %1534 = vmatprep.subr.mxu0 %v1613_v42 }
 0x5d8   :  { %v934_v0 = vpop.f32.mrf.mxu0 }
 0x5d9   :  { %1532 = vmatmul.mubr.msk.f32.vlgmr.msra.gmra.mxu0 %vm83_vm0, %v934_v0 }
 0x5da   :  { %v1528_v1 = vpop.f32.mrf.mxu0  ;;  %1535 = vmatpush3.msra.mxu0 %v1023_v63  ;;  %1542 = vmatprep.mubr.msk.f32.mxu0 %vm1614_vm3, %v1613_v42 }
 0x5db   :  { %1536 = vmatprep.subr.mxu0 %v1613_v42 }
 0x5dc   :  { %1537 = vmatpush3.msra.mxu0 %v1022_v2 }
 0x5dd   :  { %1538 = vmatprep.subr.mxu0 %v1613_v42 }
 0x5de   :  { %1539 = vmatpush3.msra.mxu0 %v1021_v3 }
 0x5df   :  { %1540 = vmatprep.subr.mxu0 %v1613_v42 }
 0x5e0   :  { %1541 = vmatpush3.msra.mxu0 %v1020_v4 }
 0x699   :  { %v1015_v9 = vpop.f32.mrf.mxu0 }
 0x69a   :  { %v1016_v10 = vadd.f32 %v1263_v8, %v1015_v9 }
 0x69b   :  { %v1533_v11 = vpop.f32.mrf.mxu0 }
 0x69c   :  { %v1019_v12 = vmax.f32 %v1016_v10, 0.0 }
 0x69e   :  { %1543 = vmatmul.mubr.msk.f32.vlgmr.msra.gmra.mxu0 %vm362_vm2, %v1019_v12 }
 0x75e   :  { %v1100_v15 = vpop.f32.mrf.mxu0 }
 0x75f   :  { %v1101_v16 = vadd.f32 %v1265_v14, %v1100_v15 }
 0x760   :  { %v1544_v17 = vpop.f32.mrf.mxu0 }
 0x761   :  { %v1104_v18 = vmax.f32 %v1101_v16, 0.0 }
 0x763   :  { %1554 = vmatmul.mubr.msk.f32.vlgmr.msra.gmra.mxu1 %vm362_vm2, %v1104_v18 }
 0x823   :  { %v1185_v27 = vpop.f32.mrf.mxu1 }
 0x824   :  { %v1186_v28 = vadd.f32 %v1267_v19, %v1185_v27 }
 0x825   :  { %v1555_v29 = vpop.f32.mrf.mxu1 }
 0x826   :  { %v1269_v30 = vmul.f32 -1.442695, %v1186_v28 }
 0x828   :  { %1562 = vpow2.f32 %v1269_v30 }
 0x835   :  { %v1563_v31 = vpop.eup %1562 }
 0x836   :  { %v1192_v32 = vadd.f32 1.0, %v1563_v31 }
 0x838   :  { %1564 = vrcp.f32 %v1192_v32 }
 0x845   :  { %v1565_v33 = vpop.eup %1564 }
 0x846   :  { %1195 = vst [vmem:[#allocation5] sm:$0xf] %v1565_v33 }
 0x847   :  { %1597 = shalt.err (!%p1594_p9)
}
 0x848   :  { %1205 = dma.vmem_to_hbm [thread:$0]  %s1203_s12, 64, %s1933_s15, [#allocation4]  }
 0x849   :  { %1608 = dma.done.wait [#allocation4], 64  }
 0x84a   :  { %1609 = vsyncadd [#allocation4], 4294967232 }
 0x84b   :  { %1209 = vsyncpa [#allocation3], 1 }
 0x84c   :  { %1210 = vsyncpa [#allocation4], 1 }

</bundles_post_ra>
